<compile_context>
chip_gen: v5e
topology: v5e:2x2
jax: 0.10.0
libtpu: 0.0.40
codegen_flags: <defaults>
</compile_context>

<pallas_src>
import math

import jax
import jax.numpy as jnp
from jax.experimental import pallas as pl
from jax.experimental.pallas import tpu as pltpu

TWO_PI = 2.0 * math.pi

LANE = 128            # vreg lane width
SUBLANE = 8           # f32 sublane count
MAX_TILE_ROWS = 1024  # 3 * 1024 * 128 * 4 B = 1.5 MiB per (1, 3, rows, 128) block


# ---------------------------------------------------------------------------
# Pallas kernel: full adjust_img pipeline for one (batch, row-tile) block.
# Input/output are in [-1, 1]; hue is carried normalized in [0, 1).
# ---------------------------------------------------------------------------
def color_jitter_kernel(factors_ref, x_ref, o_ref):
    bf = factors_ref[0]          # brightness
    cf = factors_ref[1]          # contrast
    hf = factors_ref[2]          # hue factor, pre-normalized: radians / (2*pi)
    sf = factors_ref[3]          # saturation
    shift = 0.5 + bf             # folds the [-1,1]->[0,1] rescale into brightness

    # kornia.adjust_brightness (with folded rescale), then kornia.adjust_contrast.
    r = jnp.clip(jnp.clip(x_ref[0, 0, :, :] * 0.5 + shift, 0.0, 1.0) * cf, 0.0, 1.0)
    g = jnp.clip(jnp.clip(x_ref[0, 1, :, :] * 0.5 + shift, 0.0, 1.0) * cf, 0.0, 1.0)
    b = jnp.clip(jnp.clip(x_ref[0, 2, :, :] * 0.5 + shift, 0.0, 1.0) * cf, 0.0, 1.0)

    # ---- RGB -> HSV (h normalized to [0,1)) -------------------------------
    maxc = jnp.maximum(jnp.maximum(r, g), b)
    minc = jnp.minimum(jnp.minimum(r, g), b)
    v = maxc
    deltac = maxc - minc
    # divides -> EUP approximate reciprocals (the VALU slot is the binding unit)
    s = deltac * pl.reciprocal(v + 1e-6, approx=True)
    deltac_safe = jnp.where(deltac == 0.0, 1.0, deltac)   # grey pixels stay NaN-free
    inv_d = pl.reciprocal(deltac_safe, approx=True)

    # channel-argmax with first-max tie-breaking (r, then g, then b)
    is_r = r == maxc
    is_g = jnp.logical_and(jnp.logical_not(is_r), g == maxc)
    rc = maxc - r
    gc = maxc - g
    bc = maxc - b
    h_num = jnp.where(is_r, bc - gc,
            jnp.where(is_g, 2.0 * deltac_safe + rc - bc,
                            4.0 * deltac_safe + gc - rc))
    h = jnp.mod(h_num * inv_d * (1.0 / 6.0), 1.0)

    # ---- fused hue rotation + saturation scale (one HSV round trip) -------
    h = jnp.fmod(h + hf, 1.0)          # fmod truncates; may be slightly negative
    s = jnp.clip(s * sf, 0.0, 1.0)

    # ---- HSV -> RGB, branchless -------------------------------------------
    #   c_n = v - v*s * clip(min(k_n, 4 - k_n), 0, 1),   k_n = mod(6h + n, 6)
    # floor-mod wraps negative h exactly like the reference's floor(h*6) % 6.
    vs = v * s
    h6 = h * 6.0

    def chan(n):
        k = jnp.mod(h6 + n, 6.0)
        return v - vs * jnp.clip(jnp.minimum(k, 4.0 - k), 0.0, 1.0)

    dt = o_ref.dtype
    o_ref[0, 0, :, :] = (chan(5.0) * 2.0 - 1.0).astype(dt)
    o_ref[0, 1, :, :] = (chan(3.0) * 2.0 - 1.0).astype(dt)
    o_ref[0, 2, :, :] = (chan(1.0) * 2.0 - 1.0).astype(dt)


# ---------------------------------------------------------------------------
# Wrapper: lane-dense layout + tiled pallas_call
# ---------------------------------------------------------------------------
def _round_up(x, m):
    return ((x + m - 1) // m) * m


def _choose_tiling(rows, n_batch):
    """Pick (rows_padded, tile_rows): tile_rows is a multiple of 8 that divides
    rows_padded, preferring no row padding and an even total parallel block
    count (v7x has 2 TensorCores)."""
    rows = max(rows, SUBLANE)
    tile = None
    if rows % SUBLANE == 0:
        for cand in (MAX_TILE_ROWS, 512, 256, 128, 64, 32, 16, 8):
            if cand <= rows and rows % cand == 0:
                tile = cand
                break
    if tile is not None:
        rows_p = rows
    else:
        tile = min(MAX_TILE_ROWS, _round_up(rows, SUBLANE))
        rows_p = _round_up(rows, tile)
    # Keep an even (>=2) parallel block count when it is cheap to do so.
    if (n_batch * (rows_p // tile)) % 2 == 1 and tile % 16 == 0:
        tile //= 2
    return rows_p, tile


def _launch(x, factors, tile_rows):
    """x: (N, 3, rows_padded, 128) float32; factors: (4,) float32."""
    N, C, rows_p, lane = x.shape
    return pl.pallas_call(
        color_jitter_kernel,
        out_shape=jax.ShapeDtypeStruct((N, C, rows_p, lane), x.dtype),
        grid=(N, rows_p // tile_rows),
        in_specs=[
            pl.BlockSpec(memory_space=pltpu.MemorySpace.SMEM),  # jitter factors
            # NOTE: if xprof shows exposed DMA on v5e, add
            # pipeline_mode=pl.Buffered(3) here (input only).
            pl.BlockSpec((1, C, tile_rows, lane), lambda n, t: (n, 0, t, 0)),
        ],
        out_specs=pl.BlockSpec((1, C, tile_rows, lane), lambda n, t: (n, 0, t, 0)),
        compiler_params=pltpu.CompilerParams(
            dimension_semantics=("parallel", "parallel"),
            # Blocks are <= 1.5 MiB; 4 pipeline buffers + elementwise temps stay
            # far below this on every generation (v7x scoped default is 32 MiB).
            vmem_limit_bytes=32 * 1024 * 1024,
        ),
    )(factors, x)


def adjust_img_pallas(img, factors):
    """img: (N, 3, H, W) float32 in [-1, 1]; factors: (4,) float32
    (brightness, contrast, hue/(2*pi), saturation)."""
    N, C, H, W = img.shape
    assert C == 3
    P = H * W

    if P % LANE == 0:
        rows = P // LANE
        rows_p, tile_rows = _choose_tiling(rows, N)
        if rows_p == rows:
            # Fast path: no pad, no post-slice (no extra HBM passes).
            x = img.reshape(N, C, rows, LANE)
            out = _launch(x, factors, tile_rows)
            return out.reshape(N, C, H, W)
    else:
        rows = -(-P // LANE)
        rows_p, tile_rows = _choose_tiling(rows, N)

    # Ragged path: pad the flattened pixel axis up to a full tile multiple.
    # TODO(synk): handle only the final ragged row-tile in-kernel (masked
    # pltpu.store) instead of materializing padded copies.
    p_padded = rows_p * LANE
    x = jnp.pad(img.reshape(N, C, P), ((0, 0), (0, 0), (0, p_padded - P)))
    x = x.reshape(N, C, rows_p, LANE)
    out = _launch(x, factors, tile_rows)
    return out.reshape(N, C, p_padded)[:, :, :P].reshape(N, C, H, W)


def _adjust_mixed_pallas(rgbs, factors):
    """Mixed resolutions: flatten every tensor's pixels, concatenate along the
    pixel axis, and run ONE launch (the math is pointwise, factors shared)."""
    flats, metas = [], []
    for r in rgbs:
        N, C, H, W = r.shape
        assert C == 3
        flats.append(jnp.transpose(r, (1, 0, 2, 3)).reshape(3, N * H * W))
        metas.append((N, H, W))
    slab = jnp.concatenate(flats, axis=1)
    total = slab.shape[1]
    rows = -(-total // LANE)
    rows_p, tile_rows = _choose_tiling(rows, 1)
    p_padded = rows_p * LANE
    if p_padded != total:
        slab = jnp.pad(slab, ((0, 0), (0, p_padded - total)))
    x = slab.reshape(1, 3, rows_p, LANE)
    out = _launch(x, factors, tile_rows).reshape(3, p_padded)

    outs, off = [], 0
    for (N, H, W) in metas:
        n = N * H * W
        piece = out[:, off:off + n].reshape(3, N, H, W)
        outs.append(jnp.transpose(piece, (1, 0, 2, 3)))
        off += n
    return outs


def make_factors(brightness_factor, contrast_factor, hue_factor, saturation_factor):
    """Pack jitter factors for the kernel (hue pre-normalized by 2*pi)."""
    return jnp.stack([
        jnp.asarray(brightness_factor, jnp.float32),
        jnp.asarray(contrast_factor, jnp.float32),
        jnp.asarray(hue_factor, jnp.float32) / TWO_PI,
        jnp.asarray(saturation_factor, jnp.float32),
    ]).astype(jnp.float32)


def color_jitter_forward(embedding_img, mpis, factors):
    """Mirror of ColorJitter.forward (jitter factors precomputed on host)."""
    rgbs = [embedding_img] + [mpi[:, 0:3] for mpi in mpis]

    if all(r.shape == rgbs[0].shape for r in rgbs):
        # Single fused launch: embedding + all MPI RGB planes along the batch axis.
        B = embedding_img.shape[0]
        adj = adjust_img_pallas(jnp.concatenate(rgbs, axis=0), factors)
        outs = [adj[i * B:(i + 1) * B] for i in range(len(rgbs))]
    else:
        # Mixed resolutions: still a single fused launch over a row-concatenated slab.
        outs = _adjust_mixed_pallas(rgbs, factors)

    emb = outs[0]
    adjusted_mpis = [
        jnp.concatenate([outs[1 + i], mpi[:, 3:4]], axis=1)
        for i, mpi in enumerate(mpis)
    ]
    return emb, adjusted_mpis


# ---------------------------------------------------------------------------
# Pure-JAX reference (mirrors the torch code: two RGB<->HSV round trips).
# ---------------------------------------------------------------------------
def _ref_rgb_to_hsv(image):
    r, g, b = image[:, 0], image[:, 1], image[:, 2]
    maxc = jnp.max(image, axis=1)
    max_idx = jnp.argmax(image, axis=1)
    minc = jnp.min(image, axis=1)
    v = maxc
    deltac = maxc - minc
    s = deltac / (v + 1e-6)
    deltac = jnp.where(deltac == 0.0, jnp.ones_like(deltac), deltac)
    rc, gc, bc = maxc - r, maxc - g, maxc - b
    h = jnp.where(max_idx == 0, bc - gc,
        jnp.where(max_idx == 1, 2.0 * deltac + rc - bc, 4.0 * deltac + gc - rc))
    h = (h / deltac / 6.0) % 1.0
    h = TWO_PI * h
    return jnp.stack([h, s, v], axis=1)


def _ref_hsv_to_rgb(image):
    h = image[:, 0] / TWO_PI
    s = image[:, 1]
    v = image[:, 2]
    hi = jnp.floor(h * 6.0) % 6.0
    f = (h * 6.0) % 6.0 - hi
    p = v * (1.0 - s)
    q = v * (1.0 - f * s)
    t = v * (1.0 - (1.0 - f) * s)
    hi = hi.astype(jnp.int32)

    def sel(c0, c1, c2, c3, c4, c5):
        return jnp.where(hi == 0, c0, jnp.where(hi == 1, c1, jnp.where(hi == 2, c2,
               jnp.where(hi == 3, c3, jnp.where(hi == 4, c4, c5)))))

    return jnp.stack([sel(v, q, p, p, t, v),
                      sel(t, v, v, q, p, p),
                      sel(p, p, t, v, v, q)], axis=1)


def _ref_adjust_img01(img01, bf, cf, hue_rad, sf):
    x = jnp.clip(img01 + bf, 0.0, 1.0)
    x = jnp.clip(x * cf, 0.0, 1.0)
    hsv = _ref_rgb_to_hsv(x)
    h = jnp.fmod(hsv[:, 0] + hue_rad, TWO_PI)
    x = _ref_hsv_to_rgb(jnp.stack([h, hsv[:, 1], hsv[:, 2]], axis=1))
    hsv = _ref_rgb_to_hsv(x)
    s = jnp.clip(hsv[:, 1] * sf, 0.0, 1.0)
    x = _ref_hsv_to_rgb(jnp.stack([hsv[:, 0], s, hsv[:, 2]], axis=1))
    return x


def _ref_forward(embedding_img, mpis, bf, cf, hue_rad, sf):
    def adj(img):
        return (_ref_adjust_img01((img + 1.0) * 0.5, bf, cf, hue_rad, sf) - 0.5) * 2.0
    emb = adj(embedding_img)
    out_mpis = [jnp.concatenate([adj(m[:, 0:3]), m[:, 3:4]], axis=1) for m in mpis]
    return emb, out_mpis


if __name__ == "__main__":
    key = jax.random.PRNGKey(0)
    k_img, k_m0, k_m1, kb, kh, kc, ks, k_s0, k_s1 = jax.random.split(key, 9)

    # Deterministic stand-in for opt + np.random.uniform sampling.
    brightness, hue, contrast, saturation = 0.2, 0.1, 0.2, 0.2
    brightness_factor = jax.random.uniform(kb, (), minval=-brightness, maxval=brightness)
    hue_factor = jax.random.uniform(kh, (), minval=-hue, maxval=hue)
    contrast_factor = jax.random.uniform(kc, (), minval=1.0 - contrast, maxval=1.0 + contrast)
    saturation_factor = jax.random.uniform(ks, (), minval=1.0 - saturation, maxval=1.0 + saturation)
    factors = make_factors(brightness_factor, contrast_factor, hue_factor, saturation_factor)

    B, H, W = 2, 16, 16
    embedding_img = jax.random.uniform(k_img, (B, 3, H, W), jnp.float32, -1.0, 1.0)
    mpis = [
        jax.random.uniform(k_m0, (B, 4, H, W), jnp.float32, -1.0, 1.0),
        jax.random.uniform(k_m1, (B, 4, H, W), jnp.float32, -1.0, 1.0),
    ]

    emb_out, mpi_out = color_jitter_forward(embedding_img, mpis, factors)
    jax.block_until_ready(emb_out)
    for m in mpi_out:
        jax.block_until_ready(m)

    assert emb_out.shape == (B, 3, H, W)
    assert all(m.shape == (B, 4, H, W) for m in mpi_out)
    assert bool(jnp.all(jnp.isfinite(emb_out)))

    # Numerical check vs. the two-round-trip reference (approx reciprocals and
    # the fused round trip introduce small, documented drift).
    emb_ref, mpi_ref = _ref_forward(embedding_img, mpis, brightness_factor,
                                    contrast_factor, hue_factor, saturation_factor)
    err = float(jnp.max(jnp.abs(emb_out - emb_ref)))
    for mo, mr in zip(mpi_out, mpi_ref):
        err = max(err, float(jnp.max(jnp.abs(mo - mr))))
    assert err < 5e-2, f"max abs error vs reference too large: {err}"

    # Mixed-resolution smoke test (exercises the single-launch slab path).
    emb_small = jax.random.uniform(k_s0, (1, 3, 8, 8), jnp.float32, -1.0, 1.0)
    mpi_big = [jax.random.uniform(k_s1, (1, 4, 16, 16), jnp.float32, -1.0, 1.0)]
    emb2, mpi2 = color_jitter_forward(emb_small, mpi_big, factors)
    jax.block_until_ready(emb2)
    assert emb2.shape == (1, 3, 8, 8)
    assert mpi2[0].shape == (1, 4, 16, 16)
    assert bool(jnp.all(jnp.isfinite(emb2))) and bool(jnp.all(jnp.isfinite(mpi2[0])))

    print("KERNEL_OK")
</pallas_src>

<mosaic_0001>
module attributes {stable_mosaic.version = 11 : i64} {
  func.func @color_jitter_kernel(%arg0: i32, %arg1: i32, %arg2: memref<4xf32, #tpu.memory_space<smem>>, %arg3: memref<1x3x8x128xf32, #tpu.memory_space<vmem>>, %arg4: memref<1x3x8x128xf32, #tpu.memory_space<vmem>>) attributes {dimension_semantics = [#tpu.dimension_semantics<parallel>, #tpu.dimension_semantics<parallel>], iteration_bounds = array<i64: 6, 1>, scalar_prefetch = 0 : i64, scratch_operands = 0 : i64, tpu.core_type = #tpu.core_type<tc>, window_params = [{transform_indices = @transform_0, window_bounds = array<i64: 4>}, {transform_indices = @transform_1, window_bounds = array<i64: 1, 3, 8, 128>}, {transform_indices = @transform_2, window_bounds = array<i64: 1, 3, 8, 128>}]} {
    %c0 = arith.constant 0 : index
    %0 = memref.load %arg2[%c0] : memref<4xf32, #tpu.memory_space<smem>>
    %c1 = arith.constant 1 : index
    %1 = memref.load %arg2[%c1] : memref<4xf32, #tpu.memory_space<smem>>
    %c2 = arith.constant 2 : index
    %2 = memref.load %arg2[%c2] : memref<4xf32, #tpu.memory_space<smem>>
    %c3 = arith.constant 3 : index
    %3 = memref.load %arg2[%c3] : memref<4xf32, #tpu.memory_space<smem>>
    %cst = arith.constant 5.000000e-01 : f32
    %4 = arith.addf %cst, %0 : f32
    %c0_0 = arith.constant 0 : index
    %c0_1 = arith.constant 0 : index
    %c0_2 = arith.constant 0 : index
    %c0_3 = arith.constant 0 : index
    %5 = vector.load %arg3[%c0_0, %c0_1, %c0_2, %c0_3] : memref<1x3x8x128xf32, #tpu.memory_space<vmem>>, vector<1x1x8x128xf32>
    %6 = vector.shape_cast %5 : vector<1x1x8x128xf32> to vector<8x128xf32>
    %cst_4 = arith.constant 5.000000e-01 : f32
    %7 = vector.broadcast %cst_4 : f32 to vector<8x128xf32>
    %8 = arith.mulf %6, %7 : vector<8x128xf32>
    %9 = vector.broadcast %4 : f32 to vector<8x128xf32>
    %10 = arith.addf %8, %9 : vector<8x128xf32>
    %cst_5 = arith.constant 0.000000e+00 : f32
    %cst_6 = arith.constant 1.000000e+00 : f32
    %11 = vector.broadcast %cst_5 : f32 to vector<8x128xf32>
    %12 = arith.maximumf %11, %10 : vector<8x128xf32>
    %13 = vector.broadcast %cst_6 : f32 to vector<8x128xf32>
    %14 = arith.minimumf %13, %12 : vector<8x128xf32>
    %15 = vector.broadcast %1 : f32 to vector<8x128xf32>
    %16 = arith.mulf %14, %15 : vector<8x128xf32>
    %cst_7 = arith.constant 0.000000e+00 : f32
    %cst_8 = arith.constant 1.000000e+00 : f32
    %17 = vector.broadcast %cst_7 : f32 to vector<8x128xf32>
    %18 = arith.maximumf %17, %16 : vector<8x128xf32>
    %19 = vector.broadcast %cst_8 : f32 to vector<8x128xf32>
    %20 = arith.minimumf %19, %18 : vector<8x128xf32>
    %c0_9 = arith.constant 0 : index
    %c1_10 = arith.constant 1 : index
    %c0_11 = arith.constant 0 : index
    %c0_12 = arith.constant 0 : index
    %21 = vector.load %arg3[%c0_9, %c1_10, %c0_11, %c0_12] : memref<1x3x8x128xf32, #tpu.memory_space<vmem>>, vector<1x1x8x128xf32>
    %22 = vector.shape_cast %21 : vector<1x1x8x128xf32> to vector<8x128xf32>
    %cst_13 = arith.constant 5.000000e-01 : f32
    %23 = vector.broadcast %cst_13 : f32 to vector<8x128xf32>
    %24 = arith.mulf %22, %23 : vector<8x128xf32>
    %25 = vector.broadcast %4 : f32 to vector<8x128xf32>
    %26 = arith.addf %24, %25 : vector<8x128xf32>
    %cst_14 = arith.constant 0.000000e+00 : f32
    %cst_15 = arith.constant 1.000000e+00 : f32
    %27 = vector.broadcast %cst_14 : f32 to vector<8x128xf32>
    %28 = arith.maximumf %27, %26 : vector<8x128xf32>
    %29 = vector.broadcast %cst_15 : f32 to vector<8x128xf32>
    %30 = arith.minimumf %29, %28 : vector<8x128xf32>
    %31 = vector.broadcast %1 : f32 to vector<8x128xf32>
    %32 = arith.mulf %30, %31 : vector<8x128xf32>
    %cst_16 = arith.constant 0.000000e+00 : f32
    %cst_17 = arith.constant 1.000000e+00 : f32
    %33 = vector.broadcast %cst_16 : f32 to vector<8x128xf32>
    %34 = arith.maximumf %33, %32 : vector<8x128xf32>
    %35 = vector.broadcast %cst_17 : f32 to vector<8x128xf32>
    %36 = arith.minimumf %35, %34 : vector<8x128xf32>
    %c0_18 = arith.constant 0 : index
    %c2_19 = arith.constant 2 : index
    %c0_20 = arith.constant 0 : index
    %c0_21 = arith.constant 0 : index
    %37 = vector.load %arg3[%c0_18, %c2_19, %c0_20, %c0_21] : memref<1x3x8x128xf32, #tpu.memory_space<vmem>>, vector<1x1x8x128xf32>
    %38 = vector.shape_cast %37 : vector<1x1x8x128xf32> to vector<8x128xf32>
    %cst_22 = arith.constant 5.000000e-01 : f32
    %39 = vector.broadcast %cst_22 : f32 to vector<8x128xf32>
    %40 = arith.mulf %38, %39 : vector<8x128xf32>
    %41 = vector.broadcast %4 : f32 to vector<8x128xf32>
    %42 = arith.addf %40, %41 : vector<8x128xf32>
    %cst_23 = arith.constant 0.000000e+00 : f32
    %cst_24 = arith.constant 1.000000e+00 : f32
    %43 = vector.broadcast %cst_23 : f32 to vector<8x128xf32>
    %44 = arith.maximumf %43, %42 : vector<8x128xf32>
    %45 = vector.broadcast %cst_24 : f32 to vector<8x128xf32>
    %46 = arith.minimumf %45, %44 : vector<8x128xf32>
    %47 = vector.broadcast %1 : f32 to vector<8x128xf32>
    %48 = arith.mulf %46, %47 : vector<8x128xf32>
    %cst_25 = arith.constant 0.000000e+00 : f32
    %cst_26 = arith.constant 1.000000e+00 : f32
    %49 = vector.broadcast %cst_25 : f32 to vector<8x128xf32>
    %50 = arith.maximumf %49, %48 : vector<8x128xf32>
    %51 = vector.broadcast %cst_26 : f32 to vector<8x128xf32>
    %52 = arith.minimumf %51, %50 : vector<8x128xf32>
    %53 = arith.maximumf %20, %36 : vector<8x128xf32>
    %54 = arith.maximumf %53, %52 : vector<8x128xf32>
    %55 = arith.minimumf %20, %36 : vector<8x128xf32>
    %56 = arith.minimumf %55, %52 : vector<8x128xf32>
    %57 = arith.subf %54, %56 : vector<8x128xf32>
    %cst_27 = arith.constant 9.99999997E-7 : f32
    %58 = vector.broadcast %cst_27 : f32 to vector<8x128xf32>
    %59 = arith.addf %54, %58 : vector<8x128xf32>
    %60 = tpu.reciprocal %59 {approx = true} : vector<8x128xf32> -> vector<8x128xf32>
    %61 = arith.mulf %57, %60 : vector<8x128xf32>
    %cst_28 = arith.constant 0.000000e+00 : f32
    %62 = vector.broadcast %cst_28 : f32 to vector<8x128xf32>
    %63 = arith.cmpf oeq, %57, %62 : vector<8x128xf32>
    %cst_29 = arith.constant 1.000000e+00 : f32
    %64 = vector.broadcast %cst_29 : f32 to vector<8x128xf32>
    %65 = arith.select %63, %64, %57 : vector<8x128xi1>, vector<8x128xf32>
    %66 = tpu.reciprocal %65 {approx = true} : vector<8x128xf32> -> vector<8x128xf32>
    %67 = arith.cmpf oeq, %20, %54 : vector<8x128xf32>
    %cst_30 = arith.constant dense<true> : vector<8x128xi1>
    %68 = arith.xori %67, %cst_30 : vector<8x128xi1>
    %69 = arith.cmpf oeq, %36, %54 : vector<8x128xf32>
    %70 = arith.andi %68, %69 : vector<8x128xi1>
    %71 = arith.subf %54, %20 : vector<8x128xf32>
    %72 = arith.subf %54, %36 : vector<8x128xf32>
    %73 = arith.subf %54, %52 : vector<8x128xf32>
    %74 = arith.subf %73, %72 : vector<8x128xf32>
    %cst_31 = arith.constant 2.000000e+00 : f32
    %75 = vector.broadcast %cst_31 : f32 to vector<8x128xf32>
    %76 = arith.mulf %75, %65 : vector<8x128xf32>
    %77 = arith.addf %76, %71 : vector<8x128xf32>
    %78 = arith.subf %77, %73 : vector<8x128xf32>
    %cst_32 = arith.constant 4.000000e+00 : f32
    %79 = vector.broadcast %cst_32 : f32 to vector<8x128xf32>
    %80 = arith.mulf %79, %65 : vector<8x128xf32>
    %81 = arith.addf %80, %72 : vector<8x128xf32>
    %82 = arith.subf %81, %71 : vector<8x128xf32>
    %83 = arith.select %70, %78, %82 : vector<8x128xi1>, vector<8x128xf32>
    %84 = arith.select %67, %74, %83 : vector<8x128xi1>, vector<8x128xf32>
    %85 = arith.mulf %84, %66 : vector<8x128xf32>
    %cst_33 = arith.constant 0.166666672 : f32
    %86 = vector.broadcast %cst_33 : f32 to vector<8x128xf32>
    %87 = arith.mulf %85, %86 : vector<8x128xf32>
    %cst_34 = arith.constant 1.000000e+00 : f32
    %88 = vector.broadcast %cst_34 : f32 to vector<8x128xf32>
    %89 = arith.remf %87, %88 : vector<8x128xf32>
    %cst_35 = arith.constant 0.000000e+00 : f32
    %90 = vector.broadcast %cst_35 : f32 to vector<8x128xf32>
    %91 = arith.cmpf one, %89, %90 : vector<8x128xf32>
    %cst_36 = arith.constant 0.000000e+00 : f32
    %92 = vector.broadcast %cst_36 : f32 to vector<8x128xf32>
    %93 = arith.cmpf olt, %89, %92 : vector<8x128xf32>
    %cst_37 = arith.constant 0.000000e+00 : f32
    %94 = arith.cmpf olt, %cst_34, %cst_37 : f32
    %95 = vector.broadcast %94 : i1 to vector<8x128xi1>
    %96 = vector.broadcast %95 : vector<8x128xi1> to vector<8x128xi1>
    %97 = arith.xori %93, %96 : vector<8x128xi1>
    %98 = arith.andi %97, %91 : vector<8x128xi1>
    %99 = vector.broadcast %cst_34 : f32 to vector<8x128xf32>
    %100 = arith.addf %89, %99 : vector<8x128xf32>
    %101 = arith.select %98, %100, %89 : vector<8x128xi1>, vector<8x128xf32>
    %102 = vector.broadcast %2 : f32 to vector<8x128xf32>
    %103 = arith.addf %101, %102 : vector<8x128xf32>
    %cst_38 = arith.constant 1.000000e+00 : f32
    %104 = vector.broadcast %cst_38 : f32 to vector<8x128xf32>
    %105 = arith.remf %103, %104 : vector<8x128xf32>
    %106 = vector.broadcast %3 : f32 to vector<8x128xf32>
    %107 = arith.mulf %61, %106 : vector<8x128xf32>
    %cst_39 = arith.constant 0.000000e+00 : f32
    %cst_40 = arith.constant 1.000000e+00 : f32
    %108 = vector.broadcast %cst_39 : f32 to vector<8x128xf32>
    %109 = arith.maximumf %108, %107 : vector<8x128xf32>
    %110 = vector.broadcast %cst_40 : f32 to vector<8x128xf32>
    %111 = arith.minimumf %110, %109 : vector<8x128xf32>
    %112 = arith.mulf %54, %111 : vector<8x128xf32>
    %cst_41 = arith.constant 6.000000e+00 : f32
    %113 = vector.broadcast %cst_41 : f32 to vector<8x128xf32>
    %114 = arith.mulf %105, %113 : vector<8x128xf32>
    %cst_42 = arith.constant 5.000000e+00 : f32
    %115 = vector.broadcast %cst_42 : f32 to vector<8x128xf32>
    %116 = arith.addf %114, %115 : vector<8x128xf32>
    %cst_43 = arith.constant 6.000000e+00 : f32
    %117 = vector.broadcast %cst_43 : f32 to vector<8x128xf32>
    %118 = arith.remf %116, %117 : vector<8x128xf32>
    %cst_44 = arith.constant 0.000000e+00 : f32
    %119 = vector.broadcast %cst_44 : f32 to vector<8x128xf32>
    %120 = arith.cmpf one, %118, %119 : vector<8x128xf32>
    %cst_45 = arith.constant 0.000000e+00 : f32
    %121 = vector.broadcast %cst_45 : f32 to vector<8x128xf32>
    %122 = arith.cmpf olt, %118, %121 : vector<8x128xf32>
    %cst_46 = arith.constant 0.000000e+00 : f32
    %123 = arith.cmpf olt, %cst_43, %cst_46 : f32
    %124 = vector.broadcast %123 : i1 to vector<8x128xi1>
    %125 = vector.broadcast %124 : vector<8x128xi1> to vector<8x128xi1>
    %126 = arith.xori %122, %125 : vector<8x128xi1>
    %127 = arith.andi %126, %120 : vector<8x128xi1>
    %128 = vector.broadcast %cst_43 : f32 to vector<8x128xf32>
    %129 = arith.addf %118, %128 : vector<8x128xf32>
    %130 = arith.select %127, %129, %118 : vector<8x128xi1>, vector<8x128xf32>
    %cst_47 = arith.constant 4.000000e+00 : f32
    %131 = vector.broadcast %cst_47 : f32 to vector<8x128xf32>
    %132 = arith.subf %131, %130 : vector<8x128xf32>
    %133 = arith.minimumf %130, %132 : vector<8x128xf32>
    %cst_48 = arith.constant 0.000000e+00 : f32
    %cst_49 = arith.constant 1.000000e+00 : f32
    %134 = vector.broadcast %cst_48 : f32 to vector<8x128xf32>
    %135 = arith.maximumf %134, %133 : vector<8x128xf32>
    %136 = vector.broadcast %cst_49 : f32 to vector<8x128xf32>
    %137 = arith.minimumf %136, %135 : vector<8x128xf32>
    %138 = arith.mulf %112, %137 : vector<8x128xf32>
    %139 = arith.subf %54, %138 : vector<8x128xf32>
    %cst_50 = arith.constant 2.000000e+00 : f32
    %140 = vector.broadcast %cst_50 : f32 to vector<8x128xf32>
    %141 = arith.mulf %139, %140 : vector<8x128xf32>
    %cst_51 = arith.constant 1.000000e+00 : f32
    %142 = vector.broadcast %cst_51 : f32 to vector<8x128xf32>
    %143 = arith.subf %141, %142 : vector<8x128xf32>
    %c0_52 = arith.constant 0 : index
    %c0_53 = arith.constant 0 : index
    %c0_54 = arith.constant 0 : index
    %c0_55 = arith.constant 0 : index
    %144 = vector.load %arg4[%c0_52, %c0_53, %c0_54, %c0_55] : memref<1x3x8x128xf32, #tpu.memory_space<vmem>>, vector<1x1x8x128xf32>
    %145 = vector.shape_cast %144 : vector<1x1x8x128xf32> to vector<8x128xf32>
    %146 = vector.shape_cast %143 : vector<8x128xf32> to vector<1x1x8x128xf32>
    tpu.vector_store %arg4[%c0_52, %c0_53, %c0_54, %c0_55], %146 {strides = array<i32>} : memref<1x3x8x128xf32, #tpu.memory_space<vmem>>, vector<1x1x8x128xf32>,
    %cst_56 = arith.constant 3.000000e+00 : f32
    %147 = vector.broadcast %cst_56 : f32 to vector<8x128xf32>
    %148 = arith.addf %114, %147 : vector<8x128xf32>
    %cst_57 = arith.constant 6.000000e+00 : f32
    %149 = vector.broadcast %cst_57 : f32 to vector<8x128xf32>
    %150 = arith.remf %148, %149 : vector<8x128xf32>
    %cst_58 = arith.constant 0.000000e+00 : f32
    %151 = vector.broadcast %cst_58 : f32 to vector<8x128xf32>
    %152 = arith.cmpf one, %150, %151 : vector<8x128xf32>
    %cst_59 = arith.constant 0.000000e+00 : f32
    %153 = vector.broadcast %cst_59 : f32 to vector<8x128xf32>
    %154 = arith.cmpf olt, %150, %153 : vector<8x128xf32>
    %cst_60 = arith.constant 0.000000e+00 : f32
    %155 = arith.cmpf olt, %cst_57, %cst_60 : f32
    %156 = vector.broadcast %155 : i1 to vector<8x128xi1>
    %157 = vector.broadcast %156 : vector<8x128xi1> to vector<8x128xi1>
    %158 = arith.xori %154, %157 : vector<8x128xi1>
    %159 = arith.andi %158, %152 : vector<8x128xi1>
    %160 = vector.broadcast %cst_57 : f32 to vector<8x128xf32>
    %161 = arith.addf %150, %160 : vector<8x128xf32>
    %162 = arith.select %159, %161, %150 : vector<8x128xi1>, vector<8x128xf32>
    %cst_61 = arith.constant 4.000000e+00 : f32
    %163 = vector.broadcast %cst_61 : f32 to vector<8x128xf32>
    %164 = arith.subf %163, %162 : vector<8x128xf32>
    %165 = arith.minimumf %162, %164 : vector<8x128xf32>
    %cst_62 = arith.constant 0.000000e+00 : f32
    %cst_63 = arith.constant 1.000000e+00 : f32
    %166 = vector.broadcast %cst_62 : f32 to vector<8x128xf32>
    %167 = arith.maximumf %166, %165 : vector<8x128xf32>
    %168 = vector.broadcast %cst_63 : f32 to vector<8x128xf32>
    %169 = arith.minimumf %168, %167 : vector<8x128xf32>
    %170 = arith.mulf %112, %169 : vector<8x128xf32>
    %171 = arith.subf %54, %170 : vector<8x128xf32>
    %cst_64 = arith.constant 2.000000e+00 : f32
    %172 = vector.broadcast %cst_64 : f32 to vector<8x128xf32>
    %173 = arith.mulf %171, %172 : vector<8x128xf32>
    %cst_65 = arith.constant 1.000000e+00 : f32
    %174 = vector.broadcast %cst_65 : f32 to vector<8x128xf32>
    %175 = arith.subf %173, %174 : vector<8x128xf32>
    %c0_66 = arith.constant 0 : index
    %c1_67 = arith.constant 1 : index
    %c0_68 = arith.constant 0 : index
    %c0_69 = arith.constant 0 : index
    %176 = vector.load %arg4[%c0_66, %c1_67, %c0_68, %c0_69] : memref<1x3x8x128xf32, #tpu.memory_space<vmem>>, vector<1x1x8x128xf32>
    %177 = vector.shape_cast %176 : vector<1x1x8x128xf32> to vector<8x128xf32>
    %178 = vector.shape_cast %175 : vector<8x128xf32> to vector<1x1x8x128xf32>
    tpu.vector_store %arg4[%c0_66, %c1_67, %c0_68, %c0_69], %178 {strides = array<i32>} : memref<1x3x8x128xf32, #tpu.memory_space<vmem>>, vector<1x1x8x128xf32>,
    %cst_70 = arith.constant 1.000000e+00 : f32
    %179 = vector.broadcast %cst_70 : f32 to vector<8x128xf32>
    %180 = arith.addf %114, %179 : vector<8x128xf32>
    %cst_71 = arith.constant 6.000000e+00 : f32
    %181 = vector.broadcast %cst_71 : f32 to vector<8x128xf32>
    %182 = arith.remf %180, %181 : vector<8x128xf32>
    %cst_72 = arith.constant 0.000000e+00 : f32
    %183 = vector.broadcast %cst_72 : f32 to vector<8x128xf32>
    %184 = arith.cmpf one, %182, %183 : vector<8x128xf32>
    %cst_73 = arith.constant 0.000000e+00 : f32
    %185 = vector.broadcast %cst_73 : f32 to vector<8x128xf32>
    %186 = arith.cmpf olt, %182, %185 : vector<8x128xf32>
    %cst_74 = arith.constant 0.000000e+00 : f32
    %187 = arith.cmpf olt, %cst_71, %cst_74 : f32
    %188 = vector.broadcast %187 : i1 to vector<8x128xi1>
    %189 = vector.broadcast %188 : vector<8x128xi1> to vector<8x128xi1>
    %190 = arith.xori %186, %189 : vector<8x128xi1>
    %191 = arith.andi %190, %184 : vector<8x128xi1>
    %192 = vector.broadcast %cst_71 : f32 to vector<8x128xf32>
    %193 = arith.addf %182, %192 : vector<8x128xf32>
    %194 = arith.select %191, %193, %182 : vector<8x128xi1>, vector<8x128xf32>
    %cst_75 = arith.constant 4.000000e+00 : f32
    %195 = vector.broadcast %cst_75 : f32 to vector<8x128xf32>
    %196 = arith.subf %195, %194 : vector<8x128xf32>
    %197 = arith.minimumf %194, %196 : vector<8x128xf32>
    %cst_76 = arith.constant 0.000000e+00 : f32
    %cst_77 = arith.constant 1.000000e+00 : f32
    %198 = vector.broadcast %cst_76 : f32 to vector<8x128xf32>
    %199 = arith.maximumf %198, %197 : vector<8x128xf32>
    %200 = vector.broadcast %cst_77 : f32 to vector<8x128xf32>
    %201 = arith.minimumf %200, %199 : vector<8x128xf32>
    %202 = arith.mulf %112, %201 : vector<8x128xf32>
    %203 = arith.subf %54, %202 : vector<8x128xf32>
    %cst_78 = arith.constant 2.000000e+00 : f32
    %204 = vector.broadcast %cst_78 : f32 to vector<8x128xf32>
    %205 = arith.mulf %203, %204 : vector<8x128xf32>
    %cst_79 = arith.constant 1.000000e+00 : f32
    %206 = vector.broadcast %cst_79 : f32 to vector<8x128xf32>
    %207 = arith.subf %205, %206 : vector<8x128xf32>
    %c0_80 = arith.constant 0 : index
    %c2_81 = arith.constant 2 : index
    %c0_82 = arith.constant 0 : index
    %c0_83 = arith.constant 0 : index
    %208 = vector.load %arg4[%c0_80, %c2_81, %c0_82, %c0_83] : memref<1x3x8x128xf32, #tpu.memory_space<vmem>>, vector<1x1x8x128xf32>
    %209 = vector.shape_cast %208 : vector<1x1x8x128xf32> to vector<8x128xf32>
    %210 = vector.shape_cast %207 : vector<8x128xf32> to vector<1x1x8x128xf32>
    tpu.vector_store %arg4[%c0_80, %c2_81, %c0_82, %c0_83], %210 {strides = array<i32>} : memref<1x3x8x128xf32, #tpu.memory_space<vmem>>, vector<1x1x8x128xf32>,
    return
  }
  func.func @transform_0(%arg0: i32, %arg1: i32) -> i32 {
    %c0_i32 = arith.constant 0 : i32
    %c0_i32_0 = arith.constant 0 : i32
    return %c0_i32 : i32
  }
  func.func @transform_1(%arg0: i32, %arg1: i32) -> (i32, i32, i32, i32) {
    %c0_i32 = arith.constant 0 : i32
    %c0_i32_0 = arith.constant 0 : i32
    %c0_i32_1 = arith.constant 0 : i32
    return %arg0, %c0_i32, %arg1, %c0_i32_0 : i32, i32, i32, i32
  }
  func.func @transform_2(%arg0: i32, %arg1: i32) -> (i32, i32, i32, i32) {
    %c0_i32 = arith.constant 0 : i32
    %c0_i32_0 = arith.constant 0 : i32
    %c0_i32_1 = arith.constant 0 : i32
    return %arg0, %c0_i32, %arg1, %c0_i32_0 : i32, i32, i32, i32
  }
}

</mosaic_0001>

<bundles_post_ra>
// kernel: tpu_custom_call.1
= control target key start
LH: loop header
LB: loop body
LE: loop exit
PB: predicated region body
PF: predicated region fallthrough
CT: control target
= control target key end

     0   :  { %7 = vsyncpa [#allocation5], 0  ;;  %s950_s0 = inlined_call_operand.hbm [shape: f32[4], index: 0, kind: input, shape index: {}]   ;;  %s951_s1 = inlined_call_operand.hbm [shape: f32[6,3,8,128], index: 1, kind: input, shape index: {}]   ;;  %s952_s2 = inlined_call_operand.hbm [shape: f32[6,3,8,128], index: 2, kind: output, shape index: {}]  }
   0x1   :  { %8 = vsyncpa [#allocation3], 0 }
   0x2   :  { %10 = vsyncpa [#allocation3 + $0x1], 0 }
   0x3   :  { %11 = vsyncpa [#allocation4], 0 }
   0x4   :  { %13 = vsyncpa [#allocation4 + $0x1], 0  ;;  %s781_s9 = smov 0   ;;  %s783_s10 = smov 0  }
   0x5   :  { %s785_s11 = smov 0   ;;  %s787_s12 = smov 0  }
   0x6   :  { %s789_s13 = smov 0   ;;  %s791_s14 = smov 0  }
   0x7 LB: > { %s512_s15 = sadd.s32 4294967295, %s756_s14   ;;  %s513_s16 = sadd.s32 4294967294, %s756_s14   ;;  %s756_s14 = sphi %s791_s14, %s19_s14   ;;  %s752_s13 = sphi %s789_s13, %s963_s13   ;;  %s748_s12 = sphi %s787_s12, %s962_s12   ;;  %s744_s11 = sphi %s785_s11, %s961_s11   ;;  %s740_s10 = sphi %s783_s10, %s960_s10   ;;  %s736_s9 = sphi %s781_s9, %s959_s9  }
   0x8   : > { %s61_s17 = sadd.s32 1, %s744_s11  ;;  %p68_p0 = scmp.ne.s32.totalorder %s744_s11, %s740_s10 }
   0x9   : > { %p69_p1 = scmp.eq.s32.totalorder %s756_s14, 0  ;;  %p74_p2 = scmp.ne.s32.totalorder %s740_s10, %s736_s9 }
   0xa   : > { %p819_p3 = scmp.eq.s32.totalorder %s512_s15, 0  ;;  %p100_p4 = scmp.eq.s32.totalorder %s512_s15, 5 }
   0xb   : > { %p70_p5 = por %p69_p1, %p68_p0  ;;  %p106_p6 = scmp.eq.s32.totalorder %s513_s16, 5 }
   0xc   : > { %p825_p7 = por %p819_p3, %p74_p2  ;;  %p829_p8 = por %p100_p4, %p68_p0 }
   0xd   : > { %p833_p9 = por %p106_p6, %p74_p2  ;;  %p514_p10 = scmp.ge.s32.totalorder %s756_s14, 1 }
   0xe   : > { %p113_p11 = scmp.lt.s32.totalorder %s756_s14, 7  ;;  %s125_s24 = sshll.u32 %s950_s0, 4  ;;  %s126_s24 = int_to_ptr.hbm [resolvable:$true] %s125_s24 }
   0xf   : > { %p558_p13 = scmp.lt.s32.totalorder %s756_s14, 6  ;;  %s31_s27 = sadd.s32 1, %s752_s13 }
  0x10   : > { %p842_p12 = pnand %p514_p10, %p113_p11  ;;  %p33_p4 = scmp.ge.s32.totalorder %s31_s27, 6 }
  0x11   : > { %p849_p1 = pnand %p558_p13, %p70_p5  ;;  %s136_s28 = sand.u32 1, %s744_s11  }
  0x12   : > { %p545_p0 = pneg %p842_p12  ;;  %s758_s29 = smov [#allocation2]  }
  0x13   : > { %s965_s27 = smov (%p33_p4, %s31_s27), 0  ;;  %s533_s30 = smul.u32 24, %s136_s28 }
  0x14   : > { %p546_p2 = pnand %p545_p0, %p819_p3  ;;  %s56_s3 = ssub.s32 %s752_s13, %s965_s27 }
  0x15   : > { %s534_s4 = smul.u32 24, %s752_s13  ;;  %p59_p6 = scmp.eq.s32.totalorder %s56_s3, 0 }
  0x16   : > { %548 = dma.hbm_to_smem (!%p546_p2), %s126_s24, 16, %s758_s29, [#allocation5]  }
  0x17   : > { %s146_s7 = scalar_lea.hbm %s951_s1, %s534_s4  ;;  %s140_s8 = scalar_lea.vmem [#allocation6], %s533_s30 }
  0x18   : > { %s149_s15 = sshll.u32 %s140_s8, 4  ;;  %s147_s22 = sshll.u32 %s146_s7, 4  ;;  %s150_s15 = int_to_ptr.vmem [resolvable:$true] %s149_s15  ;;  %s148_s22 = int_to_ptr.hbm [resolvable:$true] %s147_s22 }
  0x19   : > { %s868_s16 = scalar_select %p59_p6, %s744_s11, %s61_s17  }
  0x1a   : > { %s137_s23 = scalar_lea.sflag [#allocation3], %s136_s28  ;;  %s759_s24 = smov 128  }
  0x1b   : > { %s760_s29 = smov 8   ;;  %161 = sbr.rel (%p842_p12) target bundleno = 159 (0x9f), region = 28 }
  0x1c   : > { %552 = dma.hbm_to_vmem [thread:$0]  (!%p849_p1), %s148_s22, 384, %s150_s15, %s137_s23, %s759_s24, %s759_s24, %s760_s29  }
  0x20   : > { %723 = dma.done.wait (%p819_p3), [#allocation5], 16  }
  0x21   : > { %725 = vsyncadd (%p819_p3), [#allocation5], 4294967280  ;;  %s879_s17 = sand.u32 1, %s740_s10  }
  0x22   : > { %s535_s28 = smul.u32 24, %s879_s17  ;;  %s169_s30 = scalar_lea.sflag [#allocation3], %s879_s17 }
  0x24   : > { %s172_s26 = scalar_lea.vmem [#allocation6], %s535_s28 }
  0x25   : > { %727 = dma.done.wait (%p825_p7), %s169_s30, 384  }
  0x26   : > { %729 = vsyncadd (%p825_p7), %s169_s30, 4294966912 }
  0x27   : > { %178 = sfence }
  0x28   : > { %s195_s25 = sld [smem:[#allocation2]]  ;;  %v200_v0 = vld [vmem:[%s172_s26] sm:$0xff]  ;;  %v523_v1 = vld [vmem:[%s172_s26 + $0x8] sm:$0xff]  ;;  %v524_v2 = vld [vmem:[%s172_s26 + $0x10] sm:$0xff]  ;;  %v761_v26 = vmov 1.0   ;;  %vm762_vm2 = vmmov 1  }
  0x29   : > { %s520_s18 = sld [smem:[#allocation2 + $0x1]]  ;;  %v201_v3 = vmul.f32 0.5, %v200_v0  ;;  %v212_v4 = vmul.f32 0.5, %v523_v1  ;;  %v221_v5 = vmul.f32 0.5, %v524_v2  ;;  %617 = vrcp.f32 %v761_v26  ;;  %s536_s5 = smul.u32 24, %s748_s12 }
  0x2a   : > { %s521_s19 = sld [smem:[#allocation2 + $0x2]]  ;;  %v763_v60 = vmov 6.0   ;;  %s194_s15 = scalar_lea.vmem [#allocation7], %s535_s28 }
  0x2b   : > { %s522_s4 = sld [smem:[#allocation2 + $0x3]]  ;;  %s411_s8 = scalar_lea.hbm %s952_s2, %s536_s5 }
  0x2c   : > { %s412_s22 = sshll.u32 %s194_s15, 4  ;;  %s414_s12 = sshll.u32 %s411_s8, 4  ;;  %s413_s22 = int_to_ptr.vmem [resolvable:$true] %s412_s22  ;;  %s415_s12 = int_to_ptr.hbm [resolvable:$true] %s414_s12 }
  0x2d   : > { %s399_s23 = scalar_lea.sflag [#allocation4], %s879_s17  ;;  %s684_s24 = sshra.s32 %s415_s12, 4  ;;  %s685_s24 = int_to_ptr.hbm [resolvable:$true] %s684_s24 }
  0x2e   : > { %s199_s3 = sadd.f32 0.5, %s195_s25  ;;  %s686_s29 = scalar_lea.hbm %s685_s24, 24 }
  0x2f   : > { %v206_v13 = vstv %s520_s18  ;;  %v618_v31 = vpop.eup %617  ;;  %p687_p3 = scmp.ne.s32.totalorder %s685_s24, %s686_s29  ;;  %s690_s26 = scalar_lea.hbm %s952_s2, 144 }
  0x30   : > { %v202_v6 = vstv %s199_s3  ;;  %v259_v37 = vsub.f32 1.0, %v618_v31  ;;  %vm262_vm6 = vweird.f32 %v618_v31  ;;  %v277_v63 = vstv %s521_s19  ;;  %p691_p10 = scmp.lt.s32.totalorder %s685_s24, %s952_s2  ;;  %p692_p11 = scmp.lt.s32.totalorder %s690_s26, %s686_s29 }
  0x31   : > { %v203_v7 = vadd.f32 %v202_v6, %v201_v3  ;;  %v213_v8 = vadd.f32 %v212_v4, %v202_v6  ;;  %v222_v9 = vadd.f32 %v221_v5, %v202_v6  ;;  %p688_p5 = pnand %p687_p3, %p829_p8 }
  0x32   : > { %v260_v43 = vmul.f32 %v618_v31, %v259_v37  ;;  %p693_p12 = por %p692_p11, %p691_p10 }
  0x33   : > { %v204_v10 = vmax.f32 %v203_v7, 0.0  ;;  %v214_v11 = vmax.f32 %v213_v8, 0.0  ;;  %v223_v12 = vmax.f32 %v222_v9, 0.0  ;;  %p689_p7 = pneg %p688_p5 }
  0x34   : > { %v261_v49 = vadd.f32 %v618_v31, %v260_v43 }
  0x35   : > { %v205_v14 = vmin.f32 %v204_v10, 1.0  ;;  %v215_v15 = vmin.f32 %v214_v11, 1.0  ;;  %v224_v16 = vmin.f32 %v223_v12, 1.0  ;;  %p694_p13 = pnand %p693_p12, %p689_p7 }
  0x36   : > { %v263_v52 = vsel %vm262_vm6, %v618_v31, %v261_v49 }
  0x37   : > { %v207_v17 = vmul.f32 %v206_v13, %v205_v14  ;;  %v216_v18 = vmul.f32 %v215_v15, %v206_v13  ;;  %v225_v19 = vmul.f32 %v224_v16, %v206_v13 }
  0x39   : > { %v208_v20 = vmax.f32 %v207_v17, 0.0  ;;  %v217_v21 = vmax.f32 %v216_v18, 0.0  ;;  %v226_v22 = vmax.f32 %v225_v19, 0.0 }
  0x3b   : > { %v209_v23 = vmin.f32 %v208_v20, 1.0  ;;  %v218_v24 = vmin.f32 %v217_v21, 1.0  ;;  %v227_v25 = vmin.f32 %v226_v22, 1.0 }
  0x3d   : > { %v228_v27 = vmax.f32 %v209_v23, %v218_v24  ;;  %v230_v28 = vmin.f32 %v209_v23, %v218_v24 }
  0x3f   : > { %v889_v29 = vmax.f32 %v228_v27, %v227_v25  ;;  %v231_v30 = vmin.f32 %v230_v28, %v227_v25 }
  0x41   : > { %v892_v32 = vsub.f32 %v889_v29, %v231_v30  ;;  %vm239_vm0 = vcmp.eq.f32.partialorder %v209_v23, %v889_v29  ;;  %v243_v33 = vsub.f32 %v889_v29, %v209_v23  ;;  %v244_v34 = vsub.f32 %v889_v29, %v218_v24 }
  0x42   : > { %v245_v36 = vsub.f32 %v889_v29, %v227_v25  ;;  %vm240_vm3 = vmxor %vm239_vm0, %vm762_vm2  ;;  %vm241_vm4 = vcmp.eq.f32.partialorder %v218_v24, %v889_v29  ;;  %v233_v12 = vadd.f32 1e-06, %v889_v29 }
  0x43   : > { %vm236_vm1 = vcmp.eq.f32.partialorder %v892_v32, 0.0  ;;  %vm242_vm5 = vmand %vm240_vm3, %vm241_vm4 }
  0x44   : > { %v237_v35 = vsel %vm236_vm1, 1.0, %v892_v32  ;;  %v246_v42 = vsub.f32 %v245_v36, %v244_v34 }
  0x45   : > { %619 = vrcp.f32 %v237_v35  ;;  %v247_v38 = vmul.f32 2.0, %v237_v35  ;;  %v250_v39 = vmul.f32 4.0, %v237_v35 }
  0x46   : > { %621 = vrcp.f32 %v763_v60 }
  0x47   : > { %v248_v40 = vadd.f32 %v247_v38, %v243_v33  ;;  %v251_v41 = vadd.f32 %v250_v39, %v244_v34  ;;  %623 = vrcp.f32 %v233_v12  ;;  %v294_v34 = vstv %s522_s4 }
  0x49   : > { %v249_v44 = vsub.f32 %v248_v40, %v245_v36  ;;  %v252_v45 = vsub.f32 %v251_v41, %v243_v33 }
  0x4b   : > { %v620_v46 = vpop.eup %619  ;;  %v253_v47 = vsel %vm242_vm5, %v249_v44, %v252_v45 }
  0x4c   : > { %v254_v48 = vsel %vm239_vm0, %v246_v42, %v253_v47  ;;  %v622_v1 = vpop.eup %621 }
  0x4d   : > { %v255_v50 = vmul.f32 %v620_v46, %v254_v48  ;;  %v303_v4 = vmul.f32 6.0, %v622_v1  ;;  %vm307_vm12 = vweird.f32 %v622_v1  ;;  %v624_v24 = vpop.eup %623 }
  0x4e   : > { %v235_v31 = vmul.f32 %v624_v24, %v892_v32 }
  0x4f   : > { %v256_v51 = vmul.f32 0.16666667, %v255_v50  ;;  %v304_v7 = vsub.f32 1.0, %v303_v4 }
  0x50   : > { %v295_v40 = vmul.f32 %v294_v34, %v235_v31 }
  0x51   : > { %v257_v53 = vand.u32 2147483647, %v256_v51  ;;  %v270_v57 = vand.u32 2147483648, %v256_v51  ;;  %v305_v11 = vmul.f32 %v622_v1, %v304_v7 }
  0x53   : > { %v264_v54 = vmul.f32 %v263_v52, %v257_v53  ;;  %v306_v15 = vadd.f32 %v622_v1, %v305_v11 }
  0x55   : > { %v265_v55 = vfloor.f32 %v264_v54  ;;  %v308_v20 = vsel %vm307_vm12, %v622_v1, %v306_v15 }
  0x57   : > { %v266_v56 = vsub.f32 %v257_v53, %v265_v55 }
  0x59   : > { %vm267_vm7 = vcmp.eq.f32.partialorder %v266_v56, 1.0 }
  0x5a   : > { %v268_v58 = vsel %vm267_vm7, 0.0, %v266_v56 }
  0x5b   : > { %v269_v59 = vand.u32 2147483647, %v268_v58 }
  0x5d   : > { %v271_v61 = vor.u32 %v270_v57, %v269_v59 }
  0x5f   : > { %vm272_vm8 = vcmp.ne.f32.partialorder %v271_v61, 0.0  ;;  %vm273_vm9 = vcmp.lt.f32.partialorder %v271_v61, 0.0  ;;  %v275_v62 = vadd.f32 1.0, %v271_v61 }
  0x60   : > { %vm274_vm10 = vmand %vm273_vm9, %vm272_vm8 }
  0x61   : > { %v276_v0 = vsel %vm274_vm10, %v275_v62, %v271_v61 }
  0x62   : > { %v278_v2 = vadd.f32 %v277_v63, %v276_v0 }
  0x64   : > { %v279_v3 = vand.u32 2147483647, %v278_v2  ;;  %v292_v9 = vand.u32 2147483648, %v278_v2 }
  0x66   : > { %v286_v5 = vmul.f32 %v279_v3, %v263_v52  ;;  %v296_v52 = vmax.f32 %v295_v40, 0.0 }
  0x68   : > { %v287_v6 = vfloor.f32 %v286_v5  ;;  %v297_v58 = vmin.f32 %v296_v52, 1.0 }
  0x6a   : > { %v288_v8 = vsub.f32 %v279_v3, %v287_v6  ;;  %v298_v2 = vmul.f32 %v297_v58, %v889_v29 }
  0x6c   : > { %vm289_vm11 = vcmp.eq.f32.partialorder %v288_v8, 1.0 }
  0x6d   : > { %v290_v10 = vsel %vm289_vm11, 0.0, %v288_v8 }
  0x6e   : > { %v291_v13 = vand.u32 2147483647, %v290_v10 }
  0x70   : > { %v293_v14 = vor.u32 %v292_v9, %v291_v13 }
  0x72   : > { %v299_v16 = vmul.f32 6.0, %v293_v14 }
  0x74   : > { %v300_v17 = vadd.f32 5.0, %v299_v16  ;;  %v332_v18 = vadd.f32 3.0, %v299_v16  ;;  %v365_v19 = vadd.f32 1.0, %v299_v16 }
  0x76   : > { %v301_v21 = vand.u32 2147483647, %v300_v17  ;;  %v333_v22 = vand.u32 2147483647, %v332_v18  ;;  %v366_v23 = vand.u32 2147483647, %v365_v19 }
  0x77   : > { %v316_v42 = vand.u32 2147483648, %v300_v17  ;;  %v348_v43 = vand.u32 2147483648, %v332_v18  ;;  %v381_v46 = vand.u32 2147483648, %v365_v19 }
  0x78   : > { %v309_v25 = vmul.f32 %v308_v20, %v301_v21  ;;  %v341_v26 = vmul.f32 %v333_v22, %v308_v20  ;;  %v374_v27 = vmul.f32 %v366_v23, %v308_v20 }
  0x7a   : > { %v310_v28 = vfloor.f32 %v309_v25  ;;  %v342_v30 = vfloor.f32 %v341_v26  ;;  %v375_v33 = vfloor.f32 %v374_v27 }
  0x7c   : > { %v311_v35 = vmul.f32 6.0, %v310_v28  ;;  %v343_v36 = vmul.f32 6.0, %v342_v30  ;;  %v376_v37 = vmul.f32 6.0, %v375_v33 }
  0x7e   : > { %v312_v38 = vsub.f32 %v301_v21, %v311_v35  ;;  %v344_v39 = vsub.f32 %v333_v22, %v343_v36  ;;  %v377_v41 = vsub.f32 %v366_v23, %v376_v37 }
  0x80   : > { %vm313_vm13 = vcmp.eq.f32.partialorder %v312_v38, 6.0  ;;  %vm345_vm14 = vcmp.eq.f32.partialorder %v344_v39, 6.0  ;;  %vm378_vm15 = vcmp.eq.f32.partialorder %v377_v41, 6.0 }
  0x81   : > { %v314_v44 = vsel %vm313_vm13, 0.0, %v312_v38  ;;  %v346_v45 = vsel %vm345_vm14, 0.0, %v344_v39  ;;  %v379_v32 = vsel %vm378_vm15, 0.0, %v377_v41 }
  0x82   : > { %v315_v47 = vand.u32 2147483647, %v314_v44  ;;  %v347_v48 = vand.u32 2147483647, %v346_v45  ;;  %v380_v49 = vand.u32 2147483647, %v379_v32 }
  0x84   : > { %v317_v50 = vor.u32 %v316_v42, %v315_v47  ;;  %v349_v51 = vor.u32 %v348_v43, %v347_v48  ;;  %v382_v53 = vor.u32 %v381_v46, %v380_v49 }
  0x86   : > { %vm318_vm0 = vcmp.ne.f32.partialorder %v317_v50, 0.0  ;;  %vm319_vm1 = vcmp.lt.f32.partialorder %v317_v50, 0.0  ;;  %v321_v54 = vadd.f32 6.0, %v317_v50  ;;  %vm350_vm2 = vcmp.ne.f32.partialorder %v349_v51, 0.0 }
  0x87   : > { %vm320_vm3 = vmand %vm319_vm1, %vm318_vm0  ;;  %vm351_vm4 = vcmp.lt.f32.partialorder %v349_v51, 0.0  ;;  %v353_v55 = vadd.f32 6.0, %v349_v51  ;;  %vm383_vm5 = vcmp.ne.f32.partialorder %v382_v53, 0.0  ;;  %vm384_vm6 = vcmp.lt.f32.partialorder %v382_v53, 0.0 }
  0x88   : > { %v322_v56 = vsel %vm320_vm3, %v321_v54, %v317_v50  ;;  %vm352_vm7 = vmand %vm351_vm4, %vm350_vm2  ;;  %v386_v57 = vadd.f32 6.0, %v382_v53 }
  0x89   : > { %v323_v59 = vsub.f32 4.0, %v322_v56  ;;  %v354_v60 = vsel %vm352_vm7, %v353_v55, %v349_v51  ;;  %vm385_vm8 = vmand %vm384_vm6, %vm383_vm5 }
  0x8a   : > { %v355_v61 = vsub.f32 4.0, %v354_v60  ;;  %v387_v62 = vsel %vm385_vm8, %v386_v57, %v382_v53 }
  0x8b   : > { %v324_v63 = vmin.f32 %v322_v56, %v323_v59  ;;  %v388_v0 = vsub.f32 4.0, %v387_v62 }
  0x8c   : > { %v356_v1 = vmin.f32 %v354_v60, %v355_v61 }
  0x8d   : > { %v325_v3 = vmax.f32 %v324_v63, 0.0  ;;  %v389_v4 = vmin.f32 %v387_v62, %v388_v0 }
  0x8e   : > { %v357_v5 = vmax.f32 %v356_v1, 0.0 }
  0x8f   : > { %v326_v6 = vmin.f32 %v325_v3, 1.0  ;;  %v390_v7 = vmax.f32 %v389_v4, 0.0 }
  0x90   : > { %v358_v8 = vmin.f32 %v357_v5, 1.0 }
  0x91   : > { %v327_v9 = vmul.f32 %v326_v6, %v298_v2  ;;  %v391_v10 = vmin.f32 %v390_v7, 1.0 }
  0x92   : > { %v359_v11 = vmul.f32 %v358_v8, %v298_v2 }
  0x93   : > { %v328_v12 = vsub.f32 %v889_v29, %v327_v9  ;;  %v392_v13 = vmul.f32 %v391_v10, %v298_v2 }
  0x94   : > { %v360_v14 = vsub.f32 %v889_v29, %v359_v11 }
  0x95   : > { %v329_v15 = vmul.f32 2.0, %v328_v12  ;;  %v393_v16 = vsub.f32 %v889_v29, %v392_v13 }
  0x96   : > { %v361_v17 = vmul.f32 2.0, %v360_v14 }
  0x97   : > { %v525_v18 = vadd.f32 -1.0, %v329_v15  ;;  %v394_v19 = vmul.f32 2.0, %v393_v16 }
  0x98   : > { %v526_v20 = vadd.f32 -1.0, %v361_v17 }
  0x99   : > { %331 = vst [vmem:[%s194_s15] sm:$0xff] %v525_v18  ;;  %v528_v21 = vadd.f32 -1.0, %v394_v19 }
  0x9a   : > { %527 = vst [vmem:[%s194_s15 + $0x8] sm:$0xff] %v526_v20 }
  0x9b   : > { %529 = vst [vmem:[%s194_s15 + $0x10] sm:$0xff] %v528_v21 }
  0x9c   : > { %697 = shalt.err (!%p694_p13)
}
  0x9d   : > { %s764_s17 = smov 128   ;;  %s765_s3 = smov 8  }
  0x9e   : > { %543 = dma.vmem_to_hbm [thread:$0]  (%p829_p8), %s413_s22, 384, %s415_s12, %s399_s23, %s764_s17, %s764_s17, %s765_s3  }
  0x9f PF: > { %p560_p0 = scmp.ge.s32.totalorder %s756_s14, 2  ;;  %s429_s19 = sand.u32 1, %s736_s9  }
  0xa0   : > { %s430_s4 = scalar_lea.sflag [#allocation4], %s429_s19 }
  0xa1   : > { %p554_p1 = pnand %p560_p0, %p833_p9 }
  0xa3   : > { %p555_p2 = pneg %p554_p1 }
  0xa5   : > { %731 = dma.done.wait (%p555_p2), %s430_s4, 384  }
  0xa6   : > { %733 = vsyncadd (%p555_p2), %s430_s4, 4294966912  ;;  %s19_s14 = sadd.s32 1, %s756_s14   ;;  %s959_s9 = smov %s740_s10 }
  0xa7   : > { %p16_p4 = scmp.ge.s32.totalorder %s19_s14, 8   ;;  %s960_s10 = smov %s744_s11 }
  0xa8   : > { %s961_s11 = smov %s868_s16  ;;  %s962_s12 = smov %s752_s13 }
  0xa9   : > { %s963_s13 = smov %s965_s27  ;;  %18 = sbr.rel (!%p16_p4) target bundleno = 7 (0x7), region = 82 }
  0xae   :  { %436 = vsyncpa [#allocation3], 1 }
  0xaf   :  { %438 = vsyncpa [#allocation3 + $0x1], 1 }
  0xb0   :  { %439 = vsyncpa [#allocation4], 1 }
  0xb1   :  { %441 = vsyncpa [#allocation4 + $0x1], 1 }
  0xb2   :  { %442 = vsyncpa [#allocation5], 1 }
  0xb3   :  { %444 = vsyncpa [#allocation5 + $0x1], 1 }

</bundles_post_ra>
